<compile_context>
chip_gen: v5e
topology: v5e:2x2
jax: 0.10.0
libtpu: 0.0.40
codegen_flags: <defaults>
</compile_context>

<pallas_src>
import functools

import jax
import jax.numpy as jnp
from jax.experimental import pallas as pl
from jax.experimental.pallas import tpu as pltpu

IN_FEATURES = 784
HIDDEN = 32
OUT_FEATURES = 10
OUT_PAD = 128  # lane-dense padded output width (true outputs = 10)


def deep_elm_kernel(x_ref, w1t_ref, b1_ref, w2t_ref, w3t_ref, o_ref):
    # Layer 1: Linear(784, 32) + bias, tanh.
    # x arrives as f32; cast to bf16 in VMEM (free VPU work on a mem-bound kernel),
    # accumulate in f32 on the MXU.
    x_bf = x_ref[...].astype(jnp.bfloat16)
    h1 = jnp.dot(x_bf, w1t_ref[...], preferred_element_type=jnp.float32)
    h1 = jnp.tanh(h1 + b1_ref[...])  # f32 bias-add + tanh
    # Layer 2: ExtremeLinear(32, 32) -> x @ W2^T, tanh.
    h2 = jnp.dot(h1.astype(jnp.bfloat16), w2t_ref[...],
                 preferred_element_type=jnp.float32)
    h2 = jnp.tanh(h2)
    # Layer 3: ExtremeLinear(32, 10) -> x @ W3^T (zero-padded to 128 lanes).
    o = jnp.dot(h2.astype(jnp.bfloat16), w3t_ref[...],
                preferred_element_type=jnp.float32)
    o_ref[...] = o.astype(o_ref.dtype)  # bf16 store (lane-dense)


@functools.partial(jax.jit, static_argnames=("tile_b",))
def deep_elm_forward(x, w1, b1, w2_fwd, w3_fwd, *, tile_b=2048):
    """x: (B, 1, 28, 28) float32 (NCHW). Returns (B, 10) float32."""
    B = x.shape[0]
    # Row-major flatten == torch.flatten(1,-1) for contiguous NCHW input.  Kept f32.
    x_flat = x.reshape(B, -1)                                 # (B, 784) f32

    # Batch tile:
    #  * B <= tile_b: single full-extent block (any size is legal when equal to
    #    the full array dim).
    #  * B  > tile_b: tile_b rows per block (multiple of 8 sublanes); the last
    #    partial block (if any) is handled by Pallas, no padding copy of x.
    TB = B if B <= tile_b else tile_b
    grid = (pl.cdiv(B, TB),)

    # Weight prep (inside jit -> single dispatch, tiny arrays).
    w1t = w1.T.astype(jnp.bfloat16)                           # (784, 32)
    b1r = b1.reshape(1, -1).astype(jnp.float32)               # (1, 32)
    w2t = w2_fwd.T.astype(jnp.bfloat16)                       # (32, 32)
    w3t = jnp.zeros((HIDDEN, OUT_PAD), jnp.bfloat16)          # (32, 128) lane-dense
    w3t = w3t.at[:, :OUT_FEATURES].set(w3_fwd.T.astype(jnp.bfloat16))

    flops = 2 * B * (IN_FEATURES * HIDDEN + HIDDEN * HIDDEN + HIDDEN * OUT_PAD)
    transcendentals = 2 * B * HIDDEN  # two tanh layers
    bytes_accessed = (B * IN_FEATURES * 4          # x (f32, read once by the kernel)
                      + IN_FEATURES * HIDDEN * 2   # w1t (bf16)
                      + HIDDEN * 4                 # b1 (f32)
                      + HIDDEN * HIDDEN * 2        # w2t (bf16)
                      + HIDDEN * OUT_PAD * 2       # w3t (bf16)
                      + B * OUT_PAD * 2)           # output (bf16)

    out = pl.pallas_call(
        deep_elm_kernel,
        out_shape=jax.ShapeDtypeStruct((B, OUT_PAD), jnp.bfloat16),
        grid=grid,
        in_specs=[
            pl.BlockSpec((TB, IN_FEATURES), lambda i: (i, 0)),      # x: streamed per tile
            pl.BlockSpec((IN_FEATURES, HIDDEN), lambda i: (0, 0)),  # w1t: resident
            pl.BlockSpec((1, HIDDEN), lambda i: (0, 0)),            # b1: resident
            pl.BlockSpec((HIDDEN, HIDDEN), lambda i: (0, 0)),       # w2t: resident
            pl.BlockSpec((HIDDEN, OUT_PAD), lambda i: (0, 0)),      # w3t: resident
        ],
        out_specs=pl.BlockSpec((TB, OUT_PAD), lambda i: (i, 0)),
        compiler_params=pltpu.CompilerParams(
            dimension_semantics=("parallel",),
            vmem_limit_bytes=32 << 20),  # headroom for TB=2048 f32 x on v5e; <= 64MiB v7x
        cost_estimate=pl.CostEstimate(
            flops=flops,
            transcendentals=transcendentals,
            bytes_accessed=bytes_accessed),
    )(x_flat, w1t, b1r, w2t, w3t)

    # Slice off padded lanes / tail rows, upcast to f32 in the same jit.
    return out[:B, :OUT_FEATURES].astype(jnp.float32)


def init_params(key):
    """Deterministic init mimicking PyTorch kaiming_uniform_(a=sqrt(5)):
    uniform(-1/sqrt(fan_in), 1/sqrt(fan_in))."""
    k1, k1b, k2, k3 = jax.random.split(key, 4)

    def u(k, shape, fan_in):
        bound = 1.0 / jnp.sqrt(fan_in)
        return jax.random.uniform(k, shape, jnp.float32, -bound, bound)

    w1 = u(k1, (32, 784), 784.0)   # nn.Linear(784, 32) weight
    b1 = u(k1b, (32,), 784.0)      # nn.Linear bias
    w2 = u(k2, (32, 32), 32.0)     # ExtremeLinear(32, 32) forward_weight
    w3 = u(k3, (10, 32), 32.0)     # ExtremeLinear(32, 10) forward_weight
    return w1, b1, w2, w3


if __name__ == "__main__":
    key = jax.random.PRNGKey(0)
    kx, kp = jax.random.split(key)

    B = 2
    x = jax.random.normal(kx, (B, 1, 28, 28), dtype=jnp.float32)  # NCHW
    w1, b1, w2, w3 = init_params(kp)

    out = deep_elm_forward(x, w1, b1, w2, w3)
    out = jax.block_until_ready(out)

    # Pure-JAX f32 reference; kernel uses bf16 matmul inputs / bf16 output store
    # with f32 accumulation, so allow a modest tolerance.
    xf = x.reshape(B, -1)
    ref = jnp.tanh(xf @ w1.T + b1)
    ref = jnp.tanh(ref @ w2.T)
    ref = ref @ w3.T
    assert out.shape == (B, 10)
    assert jnp.allclose(out, ref, atol=3e-2, rtol=3e-2), \
        f"max abs diff {jnp.max(jnp.abs(out - ref))}"

    print("KERNEL_OK")
</pallas_src>

<mosaic_0001>
module attributes {stable_mosaic.version = 11 : i64} {
  func.func @deep_elm_kernel(%arg0: i32, %arg1: memref<2x784xf32, #tpu.memory_space<vmem>>, %arg2: memref<784x32xbf16, #tpu.memory_space<vmem>>, %arg3: memref<1x32xf32, #tpu.memory_space<vmem>>, %arg4: memref<32x32xbf16, #tpu.memory_space<vmem>>, %arg5: memref<32x128xbf16, #tpu.memory_space<vmem>>, %arg6: memref<2x128xbf16, #tpu.memory_space<vmem>>) attributes {dimension_semantics = [#tpu.dimension_semantics<parallel>], iteration_bounds = array<i64: 1>, scalar_prefetch = 0 : i64, scratch_operands = 0 : i64, tpu.core_type = #tpu.core_type<tc>, window_params = [{transform_indices = @transform_0, window_bounds = array<i64: 2, 784>}, {pipeline_mode = #tpu.pipeline_mode<synchronous>, transform_indices = @transform_1, window_bounds = array<i64: 784, 32>}, {pipeline_mode = #tpu.pipeline_mode<synchronous>, transform_indices = @transform_2, window_bounds = array<i64: 1, 32>}, {pipeline_mode = #tpu.pipeline_mode<synchronous>, transform_indices = @transform_3, window_bounds = array<i64: 32, 32>}, {pipeline_mode = #tpu.pipeline_mode<synchronous>, transform_indices = @transform_4, window_bounds = array<i64: 32, 128>}, {transform_indices = @transform_5, window_bounds = array<i64: 2, 128>}]} {
    %c0 = arith.constant 0 : index
    %c0_0 = arith.constant 0 : index
    %0 = vector.load %arg1[%c0, %c0_0] : memref<2x784xf32, #tpu.memory_space<vmem>>, vector<2x784xf32>
    %1 = arith.truncf %0 : vector<2x784xf32> to vector<2x784xbf16>
    %c0_1 = arith.constant 0 : index
    %c0_2 = arith.constant 0 : index
    %2 = vector.load %arg2[%c0_1, %c0_2] : memref<784x32xbf16, #tpu.memory_space<vmem>>, vector<784x32xbf16>
    %cst = arith.constant dense<0.000000e+00> : vector<2x32xf32>
    %3 = tpu.matmul %1, %2, %cst {dimension_numbers = #tpu.dot_dimension_numbers<[1], [0], [0], [1], [0, 0, 1, 1], [], []>} : vector<2x784xbf16>, vector<784x32xbf16>, vector<2x32xf32> -> vector<2x32xf32>
    %c0_3 = arith.constant 0 : index
    %c0_4 = arith.constant 0 : index
    %4 = vector.load %arg3[%c0_3, %c0_4] : memref<1x32xf32, #tpu.memory_space<vmem>>, vector<1x32xf32>
    %5 = vector.broadcast %4 : vector<1x32xf32> to vector<2x32xf32>
    %6 = arith.addf %3, %5 : vector<2x32xf32>
    %7 = math.tanh %6 : vector<2x32xf32>
    %8 = arith.truncf %7 : vector<2x32xf32> to vector<2x32xbf16>
    %c0_5 = arith.constant 0 : index
    %c0_6 = arith.constant 0 : index
    %9 = vector.load %arg4[%c0_5, %c0_6] : memref<32x32xbf16, #tpu.memory_space<vmem>>, vector<32x32xbf16>
    %cst_7 = arith.constant dense<0.000000e+00> : vector<2x32xf32>
    %10 = tpu.matmul %8, %9, %cst_7 {dimension_numbers = #tpu.dot_dimension_numbers<[1], [0], [0], [1], [0, 0, 1, 1], [], []>} : vector<2x32xbf16>, vector<32x32xbf16>, vector<2x32xf32> -> vector<2x32xf32>
    %11 = math.tanh %10 : vector<2x32xf32>
    %12 = arith.truncf %11 : vector<2x32xf32> to vector<2x32xbf16>
    %c0_8 = arith.constant 0 : index
    %c0_9 = arith.constant 0 : index
    %13 = vector.load %arg5[%c0_8, %c0_9] : memref<32x128xbf16, #tpu.memory_space<vmem>>, vector<32x128xbf16>
    %cst_10 = arith.constant dense<0.000000e+00> : vector<2x128xf32>
    %14 = tpu.matmul %12, %13, %cst_10 {dimension_numbers = #tpu.dot_dimension_numbers<[1], [0], [0], [1], [0, 0, 1, 1], [], []>} : vector<2x32xbf16>, vector<32x128xbf16>, vector<2x128xf32> -> vector<2x128xf32>
    %15 = arith.truncf %14 : vector<2x128xf32> to vector<2x128xbf16>
    %c0_11 = arith.constant 0 : index
    %c0_12 = arith.constant 0 : index
    %16 = vector.load %arg6[%c0_11, %c0_12] : memref<2x128xbf16, #tpu.memory_space<vmem>>, vector<2x128xbf16>
    tpu.vector_store %arg6[%c0_11, %c0_12], %15 {strides = array<i32>} : memref<2x128xbf16, #tpu.memory_space<vmem>>, vector<2x128xbf16>,
    return
  }
  func.func @transform_0(%arg0: i32) -> (i32, i32) {
    %c0_i32 = arith.constant 0 : i32
    %c0_i32_0 = arith.constant 0 : i32
    return %arg0, %c0_i32 : i32, i32
  }
  func.func @transform_1(%arg0: i32) -> (i32, i32) {
    %c0_i32 = arith.constant 0 : i32
    %c0_i32_0 = arith.constant 0 : i32
    %c0_i32_1 = arith.constant 0 : i32
    return %c0_i32, %c0_i32_0 : i32, i32
  }
  func.func @transform_2(%arg0: i32) -> (i32, i32) {
    %c0_i32 = arith.constant 0 : i32
    %c0_i32_0 = arith.constant 0 : i32
    %c0_i32_1 = arith.constant 0 : i32
    return %c0_i32, %c0_i32_0 : i32, i32
  }
  func.func @transform_3(%arg0: i32) -> (i32, i32) {
    %c0_i32 = arith.constant 0 : i32
    %c0_i32_0 = arith.constant 0 : i32
    %c0_i32_1 = arith.constant 0 : i32
    return %c0_i32, %c0_i32_0 : i32, i32
  }
  func.func @transform_4(%arg0: i32) -> (i32, i32) {
    %c0_i32 = arith.constant 0 : i32
    %c0_i32_0 = arith.constant 0 : i32
    %c0_i32_1 = arith.constant 0 : i32
    return %c0_i32, %c0_i32_0 : i32, i32
  }
  func.func @transform_5(%arg0: i32) -> (i32, i32) {
    %c0_i32 = arith.constant 0 : i32
    %c0_i32_0 = arith.constant 0 : i32
    return %arg0, %c0_i32 : i32, i32
  }
}

</mosaic_0001>

<bundles_post_ra>
// kernel: deep_elm_forward.1
= control target key start
LH: loop header
LB: loop body
LE: loop exit
PB: predicated region body
PF: predicated region fallthrough
CT: control target
= control target key end

     0   :  { %vm445_vm0 = vcmask 130048   ;;  %vm558_vm1 = vcmask 261120   ;;  %s1089_s1 = inlined_call_operand.vmem [shape: bf16[784,32], index: 1, kind: input, shape index: {}]   ;;  %s1090_s0 = inlined_call_operand.vmem [shape: f32[2,784], index: 0, kind: input, shape index: {}]   ;;  %s1091_s2 = inlined_call_operand.vmem [shape: f32[1,32], index: 2, kind: input, shape index: {}]   ;;  %s1092_s3 = inlined_call_operand.vmem [shape: bf16[32,32], index: 3, kind: input, shape index: {}]   ;;  %s1093_s4 = inlined_call_operand.vmem [shape: bf16[32,128], index: 4, kind: input, shape index: {}]   ;;  %s1094_s5 = inlined_call_operand.vmem [shape: bf16[2,128], index: 5, kind: output, shape index: {}]  }
   0x1   :  { %v837_v0 = vld [vmem:[%s1089_s1 + $0x38] sm:$0xff]  ;;  %v836_v3 = vld [vmem:[%s1089_s1 + $0x30] sm:$0xff]  ;;  %v835_v8 = vld [vmem:[%s1089_s1 + $0x28] sm:$0xff] }
   0x2   :  { %v845_v1 = vld [vmem:[%s1089_s1 + $0x78] sm:$0xff]  ;;  %449 = vmatpush.bf16.msra.mxu0 %v837_v0  ;;  %v844_v4 = vld [vmem:[%s1089_s1 + $0x70] sm:$0xff]  ;;  %v843_v9 = vld [vmem:[%s1089_s1 + $0x68] sm:$0xff] }
   0x3   :  { %v853_v2 = vld [vmem:[%s1089_s1 + $0xb8] sm:$0xff]  ;;  %462 = vmatpush.bf16.msra.mxu1 %v845_v1  ;;  %v852_v5 = vld [vmem:[%s1089_s1 + $0xb0] sm:$0xff]  ;;  %v851_v10 = vld [vmem:[%s1089_s1 + $0xa8] sm:$0xff] }
   0x4   :  { %475 = vmatpush.bf16.msra.mxu2 %v853_v2  ;;  %v861_v6 = vld [vmem:[%s1089_s1 + $0xf8] sm:$0xff]  ;;  %v860_v7 = vld [vmem:[%s1089_s1 + $0xf0] sm:$0xff]  ;;  %v859_v11 = vld [vmem:[%s1089_s1 + $0xe8] sm:$0xff] }
   0x5   :  { %488 = vmatpush.bf16.msra.mxu3 %v861_v6  ;;  %v834_v12 = vld [vmem:[%s1089_s1 + $0x20] sm:$0xff]  ;;  %v22_v16 = vld [vmem:[%s1090_s0 + $0x8] sm:$0x3f]  ;;  %v833_v18 = vld [vmem:[%s1089_s1 + $0x18] sm:$0xff] }
   0x6   :  { %450 = vmatpush.bf16.msra.mxu0 %v836_v3  ;;  %v842_v13 = vld [vmem:[%s1089_s1 + $0x60] sm:$0xff]  ;;  %27 = vst [vmem:[#allocation1 + $0x20] ss:$4 sm:$0xff] %v22_v16  ;;  %v841_v19 = vld [vmem:[%s1089_s1 + $0x58] sm:$0xff]  ;;  %v832_v22 = vld [vmem:[%s1089_s1 + $0x10] sm:$0xff] }
   0x7   :  { %463 = vmatpush.bf16.msra.mxu1 %v844_v4  ;;  %v850_v14 = vld [vmem:[%s1089_s1 + $0xa0] sm:$0xff]  ;;  %v849_v20 = vld [vmem:[%s1089_s1 + $0x98] sm:$0xff]  ;;  %v840_v23 = vld [vmem:[%s1089_s1 + $0x50] sm:$0xff] }
   0x8   :  { %476 = vmatpush.bf16.msra.mxu2 %v852_v5  ;;  %v21_v15 = vld [vmem:[%s1090_s0] sm:$0xff]  ;;  %v857_v21 = vld [vmem:[%s1089_s1 + $0xd8] sm:$0xff]  ;;  %v848_v24 = vld [vmem:[%s1089_s1 + $0x90] sm:$0xff] }
   0x9   :  { %489 = vmatpush.bf16.msra.mxu3 %v860_v7  ;;  %25 = vst [vmem:[#allocation1] ss:$4 sm:$0xff] %v21_v15  ;;  %v858_v17 = vld [vmem:[%s1089_s1 + $0xe0] sm:$0xff]  ;;  %v856_v25 = vld [vmem:[%s1089_s1 + $0xd0] sm:$0xff]  ;;  %v831_v26 = vld [vmem:[%s1089_s1 + $0x8] sm:$0xff] }
   0xa   :  { %451 = vmatpush.bf16.msra.mxu0 %v835_v8  ;;  %v839_v27 = vld [vmem:[%s1089_s1 + $0x48] sm:$0xff]  ;;  %v830_v29 = vld [vmem:[%s1089_s1] sm:$0xff]  ;;  %v869_v34 = vld [vmem:[%s1089_s1 + $0x138] sm:$0xff] }
   0xb   :  { %464 = vmatpush.bf16.msra.mxu1 %v843_v9  ;;  %v847_v28 = vld [vmem:[%s1089_s1 + $0x88] sm:$0xff]  ;;  %v838_v30 = vld [vmem:[%s1089_s1 + $0x40] sm:$0xff]  ;;  %v877_v35 = vld [vmem:[%s1089_s1 + $0x178] sm:$0xff] }
   0xc   :  { %477 = vmatpush.bf16.msra.mxu2 %v851_v10  ;;  %v855_v31 = vld [vmem:[%s1089_s1 + $0xc8] sm:$0xff]  ;;  %v846_v36 = vld [vmem:[%s1089_s1 + $0x80] sm:$0xff]  ;;  %v868_v43 = vld [vmem:[%s1089_s1 + $0x130] sm:$0xff] }
   0xd   :  { %490 = vmatpush.bf16.msra.mxu3 %v859_v11  ;;  %v854_v40 = vld [vmem:[%s1089_s1 + $0xc0] sm:$0xff]  ;;  %v876_v44 = vld [vmem:[%s1089_s1 + $0x170] sm:$0xff]  ;;  %v867_v47 = vld [vmem:[%s1089_s1 + $0x128] sm:$0xff] }
   0xe   :  { %452 = vmatpush.bf16.msra.mxu0 %v834_v12  ;;  %v878_v41 = vld [vmem:[%s1089_s1 + $0x180] sm:$0xff]  ;;  %v875_v48 = vld [vmem:[%s1089_s1 + $0x168] sm:$0xff]  ;;  %v865_v51 = vld [vmem:[%s1089_s1 + $0x118] sm:$0xff] }
   0xf   :  { %465 = vmatpush.bf16.msra.mxu1 %v842_v13  ;;  %v866_v49 = vld [vmem:[%s1089_s1 + $0x120] sm:$0xff]  ;;  %v873_v52 = vld [vmem:[%s1089_s1 + $0x158] sm:$0xff]  ;;  %v34_v53 = vld.sshfl [vmem:[#allocation1 + $0x30] sm:$0xff pattern:$0x73625140] }
  0x10   :  { %478 = vmatpush.bf16.msra.mxu2 %v850_v14  ;;  %v28_v32 = vld.sshfl [vmem:[#allocation1] sm:$0xff pattern:$0x73625140]  ;;  %v29_v33 = vld.sshfl [vmem:[#allocation1 + $0x8] sm:$0xff pattern:$0x73625140]  ;;  %v48_v56 = vpack.c.bf16 %v34_v53, %v34_v53 }
  0x11   :  { %491 = vmatpush.bf16.msra.mxu3 %v858_v17  ;;  %v30_v37 = vld.sshfl [vmem:[#allocation1 + $0x10] sm:$0xff pattern:$0x73625140]  ;;  %v42_v38 = vpack.c.bf16 %v28_v32, %v28_v32  ;;  %v43_v39 = vpack.c.bf16 %v29_v33, %v29_v33  ;;  %v31_v42 = vld.sshfl [vmem:[#allocation1 + $0x18] sm:$0xff pattern:$0x73625140] }
  0x12   :  { %453 = vmatpush.bf16.msra.mxu0 %v833_v18  ;;  %v44_v45 = vpack.c.bf16 %v30_v37, %v30_v37  ;;  %v45_v46 = vpack.c.bf16 %v31_v42, %v31_v42  ;;  %v874_v50 = vld [vmem:[%s1089_s1 + $0x160] sm:$0xff]  ;;  %v864_v54 = vld [vmem:[%s1089_s1 + $0x110] sm:$0xff]  ;;  %v863_v57 = vld [vmem:[%s1089_s1 + $0x108] sm:$0xff] }
  0x13   :  { %466 = vmatpush.bf16.msra.mxu1 %v841_v19  ;;  %v872_v55 = vld [vmem:[%s1089_s1 + $0x150] sm:$0xff]  ;;  %v871_v58 = vld [vmem:[%s1089_s1 + $0x148] sm:$0xff]  ;;  %v862_v59 = vld [vmem:[%s1089_s1 + $0x100] sm:$0xff] }
  0x14   :  { %479 = vmatpush.bf16.msra.mxu2 %v849_v20  ;;  %v870_v60 = vld [vmem:[%s1089_s1 + $0x140] sm:$0xff]  ;;  %v33_v62 = vld.sshfl [vmem:[#allocation1 + $0x28] sm:$0xff pattern:$0x73625140] }
  0x15   :  { %492 = vmatpush.bf16.msra.mxu3 %v857_v21  ;;  %v32_v61 = vld.sshfl [vmem:[#allocation1 + $0x20] sm:$0xff pattern:$0x73625140]  ;;  %v47_v0 = vpack.c.bf16 %v33_v62, %v33_v62  ;;  %v880_v3 = vld [vmem:[%s1092_s3 + $0x8] sm:$0xff] }
  0x16   :  { %454 = vmatpush.bf16.msra.mxu0 %v832_v22  ;;  %v46_v63 = vpack.c.bf16 %v32_v61, %v32_v61  ;;  %v879_v6 = vld [vmem:[%s1092_s3] sm:$0xff]  ;;  %v882_v10 = vld [vmem:[%s1093_s4 + $0x8] sm:$0xff] }
  0x17   :  { %467 = vmatpush.bf16.msra.mxu1 %v840_v23  ;;  %v883_v9 = vld [vmem:[%s1091_s2] ss:$0 sm:$0xff] }
  0x18   :  { %480 = vmatpush.bf16.msra.mxu2 %v848_v24 }
  0x19   :  { %493 = vmatpush.bf16.msra.mxu3 %v856_v25 }
  0x1a   :  { %455 = vmatpush.bf16.msra.mxu0 %v831_v26 }
  0x1b   :  { %468 = vmatpush.bf16.msra.mxu1 %v839_v27 }
  0x1c   :  { %481 = vmatpush.bf16.msra.mxu2 %v847_v28  ;;  %v881_v28 = vld [vmem:[%s1093_s4] sm:$0xff] }
  0x1d   :  { %494 = vmatpush.bf16.msra.mxu3 %v855_v31 }
  0x1e   :  { %456 = vmatpush.bf16.msra.mxu0 %v830_v29 }
  0x1f   :  { %469 = vmatpush.bf16.msra.mxu1 %v838_v30 }
  0x20   :  { %482 = vmatpush.bf16.msra.mxu2 %v846_v36 }
  0x21   :  { %457 = vmatmul.bf16.vlgmr.msra.gmra.mxu0 %v42_v38  ;;  %495 = vmatpush.bf16.msra.mxu3 %v854_v40 }
  0x22   :  { %501 = vmatpush.bf16.msrb.mxu0 %v869_v34  ;;  %470 = vmatmul.bf16.vlgmr.msra.gmra.mxu1 %v43_v39 }
  0x23   :  { %514 = vmatpush.bf16.msrb.mxu1 %v877_v35  ;;  %483 = vmatmul.bf16.vlgmr.msra.gmra.mxu2 %v44_v45 }
  0x24   :  { %534 = vmatpush.bf16.msrb.mxu2 %v878_v41  ;;  %496 = vmatmul.bf16.vlgmr.msra.gmra.mxu3 %v45_v46 }
  0x25   :  { %568 = vmatpush.bf16.msrb.mxu3 %v880_v3 }
  0x26   :  { %502 = vmatpush.bf16.msrb.mxu0 %v868_v43 }
  0x27   :  { %515 = vmatpush.bf16.msrb.mxu1 %v876_v44 }
  0x28   :  { %602 = vmatpush.bf16.msra.mxu2 %v882_v10 }
  0x29   :  { %569 = vmatpush.bf16.msrb.mxu3 %v879_v6 }
  0x2a   :  { %503 = vmatpush.bf16.msrb.mxu0 %v867_v47 }
  0x2b   :  { %516 = vmatpush.bf16.msrb.mxu1 %v875_v48 }
  0x2c   :  { %603 = vmatpush.bf16.msra.mxu2 %v881_v28 }
  0x2e   :  { %504 = vmatpush.bf16.msrb.mxu0 %v866_v49 }
  0x2f   :  { %517 = vmatpush.bf16.msrb.mxu1 %v874_v50 }
  0x32   :  { %505 = vmatpush.bf16.msrb.mxu0 %v865_v51 }
  0x33   :  { %518 = vmatpush.bf16.msrb.mxu1 %v873_v52  ;;  %811 = vmatmul.msk.bf16.vlgmr.msrb.gmra.mxu2 %vm445_vm0, %v48_v56 }
  0x36   :  { %506 = vmatpush.bf16.msrb.mxu0 %v864_v54 }
  0x37   :  { %519 = vmatpush.bf16.msrb.mxu1 %v872_v55 }
  0x3a   :  { %507 = vmatpush.bf16.msrb.mxu0 %v863_v57 }
  0x3b   :  { %520 = vmatpush.bf16.msrb.mxu1 %v871_v58 }
  0x3e   :  { %508 = vmatpush.bf16.msrb.mxu0 %v862_v59 }
  0x3f   :  { %521 = vmatpush.bf16.msrb.mxu1 %v870_v60 }
  0x41   :  { %509 = vmatmul.bf16.vlgmr.msrb.gmra.mxu0 %v46_v63 }
  0x42   :  { %522 = vmatmul.bf16.vlgmr.msrb.gmra.mxu1 %v47_v0 }
  0x9e   :  { %v458_v1 = vpop.f32.mrf.mxu0 }
  0x9f   :  { %v471_v2 = vpop.f32.mrf.mxu1  ;;  %v459_v11 = vadd.f32 %v883_v9, %v458_v1 }
  0xa1   :  { %v472_v14 = vadd.f32 %v471_v2, %v459_v11 }
  0xa6   :  { %v460_v4 = vpop.f32.mrf.mxu0  ;;  %v484_v7 = vpop.f32.mrf.mxu2 }
  0xa7   :  { %v473_v5 = vpop.f32.mrf.mxu1  ;;  %v497_v8 = vpop.f32.mrf.mxu3  ;;  %v485_v15 = vadd.f32 %v484_v7, %v472_v14 }
  0xa9   :  { %v498_v17 = vadd.f32 %v497_v8, %v485_v15 }
  0xae   :  { %v486_v12 = vpop.f32.mrf.mxu2 }
  0xaf   :  { %v499_v13 = vpop.f32.mrf.mxu3 }
  0xb6   :  { %v536_v16 = vpop.f32.mrf.mxu2 }
  0xbe   :  { %v510_v18 = vpop.f32.mrf.mxu0  ;;  %v538_v22 = vpop.f32.mrf.mxu2 }
  0xbf   :  { %v523_v19 = vpop.f32.mrf.mxu1  ;;  %v511_v20 = vadd.f32 %v510_v18, %v498_v17 }
  0xc1   :  { %v524_v21 = vadd.f32 %v523_v19, %v511_v20 }
  0xc3   :  { %v537_v23 = vadd.f32 %v536_v16, %v524_v21 }
  0xc5   :  { %884 = vtanh.f32 %v537_v23 }
  0xc6   :  { %v512_v24 = vpop.f32.mrf.mxu0 }
  0xc7   :  { %v525_v25 = vpop.f32.mrf.mxu1 }
  0xcb   :  { %v885_v26 = vpop.eup %884 }
  0xcc   :  { %v541_v27 = vpack.c.bf16 %v885_v26, %v885_v26 }
  0xce   :  { %820 = vmatmul.msk.bf16.vlgmr.msrb.gmra.mxu3 %vm558_vm1, %v541_v27 }
 0x151   :  { %v571_v29 = vpop.f32.mrf.mxu3 }
 0x152   :  { %886 = vtanh.f32 %v571_v29 }
 0x158   :  { %v887_v30 = vpop.eup %886 }
 0x159   :  { %v576_v31 = vpack.c.bf16 %v887_v30, %v887_v30  ;;  %v573_v32 = vpop.f32.mrf.mxu3 }
 0x15b   :  { %829 = vmatmul.msk.bf16.vlgmr.msra.gmra.mxu2 %vm558_vm1, %v576_v31 }
 0x1de   :  { %v605_v33 = vpop.f32.mrf.mxu2 }
 0x1df   :  { %v609_v34 = vpack.c.bf16 %v605_v33, %v605_v33 }
 0x1e1   :  { %610 = vst [vmem:[%s1094_s5] sm:$0x1] %v609_v34 }
 0x1e6   :  { %v607_v35 = vpop.f32.mrf.mxu2 }

</bundles_post_ra>
